<compile_context>
chip_gen: v6e
topology: v6e:2x2x1
jax: 0.10.0
libtpu: 0.0.40
codegen_flags: <defaults>
</compile_context>

<pallas_src>
import functools

import jax
import jax.numpy as jnp
from jax.experimental import pallas as pl
from jax.experimental.pallas import tpu as pltpu


def _round_up(x, m):
    return (x + m - 1) // m * m


# ----------------------------------------------------------------------------- kernel


def _rnd_kernel(n_hidden, batch, tile_b, blocks_per_split, inv_splits, needs_mask,
                x_ref, w0_ref, b0_ref, *rest):
    """Fused f / f_hat forward with batch-sum accumulation.

    rest = [Wh_1, bh_1, ..., Wh_n, bh_n, W_fin, b_fin, out_ref, acc_ref]
      Wh_l : block-diagonal fused hidden weight, (HP, HP), compute dtype
      W_fin: [-W_f_last ; +W_hat_last] packed, (HP, OP), compute dtype
      acc  : (1, HP) f32 scratch holding sum over batch of the last hidden activations
    """
    acc_ref = rest[-1]
    out_ref = rest[-2]
    bfin_ref = rest[-3]
    wfin_ref = rest[-4]
    hidden_refs = rest[: 2 * n_hidden]

    p = pl.program_id(0)          # megacore split (parallel)
    i = pl.program_id(1)          # batch tile (arbitrary / reduction)

    @pl.when(i == 0)
    def _init():
        acc_ref[...] = jnp.zeros_like(acc_ref)

    # ---- fused MLP body (layer 0 + n_hidden fused hidden layers, all with ReLU) ----
    x = x_ref[...]                                              # (tile_b, ob_dim), compute dtype
    h = jnp.dot(x, w0_ref[...], preferred_element_type=jnp.float32) + b0_ref[...]
    h = jnp.maximum(h, 0.0)                                     # f32
    for l in range(n_hidden):
        w = hidden_refs[2 * l][...]
        b = hidden_refs[2 * l + 1][...]
        h = jnp.dot(h.astype(w.dtype), w, preferred_element_type=jnp.float32) + b
        h = jnp.maximum(h, 0.0)

    # ---- mask padded rows (bias terms would otherwise pollute the sum) ----
    if needs_mask:
        start = (p * blocks_per_split + i) * tile_b
        rows = start + jax.lax.broadcasted_iota(jnp.int32, (tile_b, 1), 0)
        h = jnp.where(rows < batch, h, 0.0)

    # ---- accumulate sum over this tile's rows ----
    acc_ref[...] += jnp.sum(h, axis=0, keepdims=True)           # (1, HP) f32

    # ---- hoisted final linear: applied once per split at the last batch tile ----
    @pl.when(i == pl.num_programs(1) - 1)
    def _finalize():
        mean_h = acc_ref[...] * (1.0 / batch)                   # (1, HP) f32
        wfin = wfin_ref[...]
        res = jnp.dot(mean_h.astype(wfin.dtype), wfin,
                      preferred_element_type=jnp.float32)
        res = res + bfin_ref[...] * inv_splits                  # bias split across cores
        out_ref[...] = jnp.broadcast_to(res, out_ref.shape)     # lane-dense (8, OP) store


# ----------------------------------------------------------------------------- packing


def _pack_params(f_params, fhat_params, S, HP, OP, output_size, compute_dtype):
    """Fuse f / f_hat parameters into lane-padded, block-diagonal arrays."""
    n_linears = len(f_params)
    n_hidden = n_linears - 2
    ob_dim = f_params[0][0].shape[0]
    f32 = jnp.float32

    # Layer 0: concat along out-dim, pad to HP lanes.
    w0 = jnp.zeros((ob_dim, HP), f32)
    w0 = w0.at[:, :S].set(f_params[0][0]).at[:, S:2 * S].set(fhat_params[0][0])
    b0 = jnp.zeros((1, HP), f32)
    b0 = b0.at[:, :S].set(f_params[0][1]).at[:, S:2 * S].set(fhat_params[0][1])

    # Hidden layers: block-diagonal (HP, HP).
    hidden = []
    for l in range(1, 1 + n_hidden):
        w = jnp.zeros((HP, HP), f32)
        w = w.at[:S, :S].set(f_params[l][0]).at[S:2 * S, S:2 * S].set(fhat_params[l][0])
        b = jnp.zeros((1, HP), f32)
        b = b.at[:, :S].set(f_params[l][1]).at[:, S:2 * S].set(fhat_params[l][1])
        hidden.append((w.astype(compute_dtype), b))             # bias stays f32

    # Final layer: packed so that mean_h @ W_fin + b_fin == mean(f_hat(x) - f(x)).
    wfin = jnp.zeros((HP, OP), f32)
    wfin = wfin.at[:S, :output_size].set(-f_params[-1][0])
    wfin = wfin.at[S:2 * S, :output_size].set(fhat_params[-1][0])
    bfin = jnp.zeros((1, OP), f32)
    bfin = bfin.at[:, :output_size].set(fhat_params[-1][1] - f_params[-1][1])

    return (w0.astype(compute_dtype), b0, hidden,
            wfin.astype(compute_dtype), bfin)


# ----------------------------------------------------------------------------- wrapper


def rnd_forward(ob_no, f_params, fhat_params, *, compute_dtype=jnp.float32,
                tile_b_max=1024, parallel_splits=2):
    """mean(f_hat(ob_no) - f(ob_no), axis=0) via a single fused Pallas kernel."""
    assert len(f_params) == len(fhat_params)
    batch, ob_dim = ob_no.shape
    n_linears = len(f_params)
    n_hidden = n_linears - 2
    S = f_params[0][0].shape[1]
    output_size = f_params[-1][0].shape[1]
    HP = _round_up(2 * S, 128)          # fused hidden width, lane-padded
    OP = _round_up(output_size, 128)    # lane-padded output width

    # Don't fan out across cores for tiny batches (avoids pure-padding splits).
    parallel_splits = max(1, min(parallel_splits, pl.cdiv(batch, 32)))

    # Batch tiling: tile_b multiple of 32 (covers f32 8-sublane / bf16 16-sublane rules).
    tile_b = _round_up(min(tile_b_max, max(1, pl.cdiv(batch, parallel_splits))), 32)
    blocks_per_split = pl.cdiv(batch, parallel_splits * tile_b)
    padded_batch = parallel_splits * blocks_per_split * tile_b
    needs_mask = padded_batch != batch

    x = ob_no.astype(compute_dtype)
    if needs_mask:
        x = jnp.pad(x, ((0, padded_batch - batch), (0, 0)))

    w0, b0, hidden, wfin, bfin = _pack_params(
        f_params, fhat_params, S, HP, OP, output_size, compute_dtype)

    const_map = lambda p, i: (0, 0)
    flat_inputs = [x, w0, b0]
    in_specs = [
        pl.BlockSpec((tile_b, ob_dim),
                     lambda p, i, bps=blocks_per_split: (p * bps + i, 0)),
        pl.BlockSpec((ob_dim, HP), const_map),
        pl.BlockSpec((1, HP), const_map),
    ]
    for (w, b) in hidden:
        flat_inputs += [w, b]
        in_specs += [pl.BlockSpec((HP, HP), const_map),
                     pl.BlockSpec((1, HP), const_map)]
    flat_inputs += [wfin, bfin]
    in_specs += [pl.BlockSpec((HP, OP), const_map),
                 pl.BlockSpec((1, OP), const_map)]

    # Lane-dense, sublane-aligned output: 8 identical rows per split, sliced below.
    out_rows = 8
    out_shape = jax.ShapeDtypeStruct((parallel_splits * out_rows, OP), jnp.float32)
    out_spec = pl.BlockSpec((out_rows, OP), lambda p, i: (p, 0))

    kernel = functools.partial(
        _rnd_kernel, n_hidden, batch, tile_b, blocks_per_split,
        1.0 / parallel_splits, needs_mask)

    flops = 2 * padded_batch * (ob_dim * HP + n_hidden * HP * HP) + 2 * HP * OP
    bytes_accessed = (sum(int(a.size) * a.dtype.itemsize for a in flat_inputs)
                      + parallel_splits * out_rows * OP * 4)

    out = pl.pallas_call(
        kernel,
        out_shape=out_shape,
        grid_spec=pltpu.PrefetchScalarGridSpec(
            num_scalar_prefetch=0,
            grid=(parallel_splits, blocks_per_split),
            in_specs=in_specs,
            out_specs=out_spec,
            scratch_shapes=[pltpu.VMEM((1, HP), jnp.float32)]),
        compiler_params=pltpu.CompilerParams(
            dimension_semantics=("parallel", "arbitrary"),
            vmem_limit_bytes=32 * 1024 * 1024),
        cost_estimate=pl.CostEstimate(
            flops=flops, transcendentals=0, bytes_accessed=bytes_accessed),
    )(*flat_inputs)

    # Combine per-split partials (each split already folded in 1/parallel_splits of the
    # bias), drop lane padding.
    per_split = out.reshape(parallel_splits, out_rows, OP)[:, 0, :]
    return jnp.sum(per_split, axis=0)[:output_size]


# ----------------------------------------------------------------------------- helpers


def init_params(key, ob_dim, size, output_size, n_layers, method):
    """Deterministic init mirroring init_method_1 (uniform) / init_method_2 (normal)."""
    dims = [(ob_dim, size)] + [(size, size)] * n_layers + [(size, output_size)]
    params = []
    for din, dout in dims:
        key, kw, kb = jax.random.split(key, 3)
        if method == "uniform":
            W = jax.random.uniform(kw, (din, dout), dtype=jnp.float32)
            b = jax.random.uniform(kb, (1, dout), dtype=jnp.float32)
        else:
            W = jax.random.normal(kw, (din, dout), dtype=jnp.float32)
            b = jax.random.normal(kb, (1, dout), dtype=jnp.float32)
        params.append((W, b))
    return params, key


def reference_forward(ob_no, f_params, fhat_params):
    """Pure-JAX (f32, unfused) reference for correctness checking."""
    def mlp(x, ps):
        h = x
        for i, (W, b) in enumerate(ps):
            h = h @ W + b
            if i < len(ps) - 1:
                h = jnp.maximum(h, 0.0)
        return h
    return jnp.mean(mlp(ob_no, fhat_params) - mlp(ob_no, f_params), axis=0)


# ----------------------------------------------------------------------------- demo


if __name__ == "__main__":
    # Small, module-consistent hparams.
    ob_dim = 16          # hparams['ob_dim']
    size = 32            # hparams['rnd_size']
    output_size = 8      # hparams['rnd_output_size']
    n_layers = 2         # hparams['rnd_n_layers']

    key = jax.random.PRNGKey(0)
    f_params, key = init_params(key, ob_dim, size, output_size, n_layers, "uniform")   # init_method_1
    fhat_params, key = init_params(key, ob_dim, size, output_size, n_layers, "normal") # init_method_2

    # --- case 1: tiny batch, f32, single split / single batch tile ---
    key, kx = jax.random.split(key)
    ob_no = jax.random.normal(kx, (8, ob_dim), dtype=jnp.float32)
    fwd1 = jax.jit(lambda x, fp, fhp: rnd_forward(x, fp, fhp))
    err = jax.block_until_ready(fwd1(ob_no, f_params, fhat_params))
    ref = reference_forward(ob_no, f_params, fhat_params)
    assert err.shape == (output_size,)
    assert jnp.allclose(err, ref, atol=1e-4, rtol=1e-4), "f32 (batch=8) mismatch vs reference"

    # --- case 2: non-multiple batch, small tiles -> megacore split + multi-step
    #     reduction grid + padded-row masking ---
    key, kx2 = jax.random.split(key)
    ob_no2 = jax.random.normal(kx2, (200, ob_dim), dtype=jnp.float32)
    fwd2 = jax.jit(lambda x, fp, fhp: rnd_forward(x, fp, fhp, tile_b_max=64))
    err2 = jax.block_until_ready(fwd2(ob_no2, f_params, fhat_params))
    ref2 = reference_forward(ob_no2, f_params, fhat_params)
    assert jnp.allclose(err2, ref2, atol=1e-3, rtol=1e-4), "f32 (batch=200, tiled) mismatch"

    print("KERNEL_OK")
</pallas_src>

<mosaic_0001>
module attributes {stable_mosaic.version = 11 : i64} {
  func.func @_rnd_kernel(%arg0: i32, %arg1: i32, %arg2: memref<32x16xf32, #tpu.memory_space<vmem>>, %arg3: memref<16x128xf32, #tpu.memory_space<vmem>>, %arg4: memref<1x128xf32, #tpu.memory_space<vmem>>, %arg5: memref<128x128xf32, #tpu.memory_space<vmem>>, %arg6: memref<1x128xf32, #tpu.memory_space<vmem>>, %arg7: memref<128x128xf32, #tpu.memory_space<vmem>>, %arg8: memref<1x128xf32, #tpu.memory_space<vmem>>, %arg9: memref<128x128xf32, #tpu.memory_space<vmem>>, %arg10: memref<1x128xf32, #tpu.memory_space<vmem>>, %arg11: memref<8x128xf32, #tpu.memory_space<vmem>>, %arg12: memref<1x128xf32, #tpu.memory_space<vmem>>) attributes {dimension_semantics = [#tpu.dimension_semantics<parallel>, #tpu.dimension_semantics<arbitrary>], iteration_bounds = array<i64: 1, 1>, scalar_prefetch = 0 : i64, scratch_operands = 1 : i64, tpu.core_type = #tpu.core_type<tc>, window_params = [{transform_indices = @transform_0, window_bounds = array<i64: 32, 16>}, {pipeline_mode = #tpu.pipeline_mode<synchronous>, transform_indices = @transform_1, window_bounds = array<i64: 16, 128>}, {pipeline_mode = #tpu.pipeline_mode<synchronous>, transform_indices = @transform_2, window_bounds = array<i64: 1, 128>}, {pipeline_mode = #tpu.pipeline_mode<synchronous>, transform_indices = @transform_3, window_bounds = array<i64: 128, 128>}, {pipeline_mode = #tpu.pipeline_mode<synchronous>, transform_indices = @transform_4, window_bounds = array<i64: 1, 128>}, {pipeline_mode = #tpu.pipeline_mode<synchronous>, transform_indices = @transform_5, window_bounds = array<i64: 128, 128>}, {pipeline_mode = #tpu.pipeline_mode<synchronous>, transform_indices = @transform_6, window_bounds = array<i64: 1, 128>}, {pipeline_mode = #tpu.pipeline_mode<synchronous>, transform_indices = @transform_7, window_bounds = array<i64: 128, 128>}, {pipeline_mode = #tpu.pipeline_mode<synchronous>, transform_indices = @transform_8, window_bounds = array<i64: 1, 128>}, {transform_indices = @transform_9, window_bounds = array<i64: 8, 128>}]} {
    %c0_i32 = arith.constant 0 : i32
    %0 = arith.cmpi eq, %arg1, %c0_i32 : i32
    %1 = arith.extui %0 : i1 to i32
    %c0_i32_0 = arith.constant 0 : i32
    %2 = arith.cmpi ne, %1, %c0_i32_0 : i32
    scf.if %2 {
      %cst_27 = arith.constant 0.000000e+00 : f32
      %45 = vector.broadcast %cst_27 : f32 to vector<1x128xf32>
      %c0_28 = arith.constant 0 : index
      %c0_29 = arith.constant 0 : index
      %46 = vector.load %arg12[%c0_28, %c0_29] : memref<1x128xf32, #tpu.memory_space<vmem>>, vector<1x128xf32>
      tpu.vector_store %arg12[%c0_28, %c0_29], %45 {strides = array<i32>} : memref<1x128xf32, #tpu.memory_space<vmem>>, vector<1x128xf32>,
    } else {
    }
    %c0 = arith.constant 0 : index
    %c0_1 = arith.constant 0 : index
    %3 = vector.load %arg2[%c0, %c0_1] : memref<32x16xf32, #tpu.memory_space<vmem>>, vector<32x16xf32>
    %c0_2 = arith.constant 0 : index
    %c0_3 = arith.constant 0 : index
    %4 = vector.load %arg3[%c0_2, %c0_3] : memref<16x128xf32, #tpu.memory_space<vmem>>, vector<16x128xf32>
    %cst = arith.constant dense<0.000000e+00> : vector<32x128xf32>
    %5 = tpu.matmul %3, %4, %cst {dimension_numbers = #tpu.dot_dimension_numbers<[1], [0], [0], [1], [0, 0, 1, 1], [], []>} : vector<32x16xf32>, vector<16x128xf32>, vector<32x128xf32> -> vector<32x128xf32>
    %c0_4 = arith.constant 0 : index
    %c0_5 = arith.constant 0 : index
    %6 = vector.load %arg4[%c0_4, %c0_5] : memref<1x128xf32, #tpu.memory_space<vmem>>, vector<1x128xf32>
    %7 = vector.broadcast %6 : vector<1x128xf32> to vector<32x128xf32>
    %8 = arith.addf %5, %7 : vector<32x128xf32>
    %cst_6 = arith.constant 0.000000e+00 : f32
    %9 = vector.broadcast %cst_6 : f32 to vector<32x128xf32>
    %10 = arith.maximumf %8, %9 : vector<32x128xf32>
    %c0_7 = arith.constant 0 : index
    %c0_8 = arith.constant 0 : index
    %11 = vector.load %arg5[%c0_7, %c0_8] : memref<128x128xf32, #tpu.memory_space<vmem>>, vector<128x128xf32>
    %c0_9 = arith.constant 0 : index
    %c0_10 = arith.constant 0 : index
    %12 = vector.load %arg6[%c0_9, %c0_10] : memref<1x128xf32, #tpu.memory_space<vmem>>, vector<1x128xf32>
    %cst_11 = arith.constant dense<0.000000e+00> : vector<32x128xf32>
    %13 = tpu.matmul %10, %11, %cst_11 {dimension_numbers = #tpu.dot_dimension_numbers<[1], [0], [0], [1], [0, 0, 1, 1], [], []>} : vector<32x128xf32>, vector<128x128xf32>, vector<32x128xf32> -> vector<32x128xf32>
    %14 = vector.broadcast %12 : vector<1x128xf32> to vector<32x128xf32>
    %15 = arith.addf %13, %14 : vector<32x128xf32>
    %cst_12 = arith.constant 0.000000e+00 : f32
    %16 = vector.broadcast %cst_12 : f32 to vector<32x128xf32>
    %17 = arith.maximumf %15, %16 : vector<32x128xf32>
    %c0_13 = arith.constant 0 : index
    %c0_14 = arith.constant 0 : index
    %18 = vector.load %arg7[%c0_13, %c0_14] : memref<128x128xf32, #tpu.memory_space<vmem>>, vector<128x128xf32>
    %c0_15 = arith.constant 0 : index
    %c0_16 = arith.constant 0 : index
    %19 = vector.load %arg8[%c0_15, %c0_16] : memref<1x128xf32, #tpu.memory_space<vmem>>, vector<1x128xf32>
    %cst_17 = arith.constant dense<0.000000e+00> : vector<32x128xf32>
    %20 = tpu.matmul %17, %18, %cst_17 {dimension_numbers = #tpu.dot_dimension_numbers<[1], [0], [0], [1], [0, 0, 1, 1], [], []>} : vector<32x128xf32>, vector<128x128xf32>, vector<32x128xf32> -> vector<32x128xf32>
    %21 = vector.broadcast %19 : vector<1x128xf32> to vector<32x128xf32>
    %22 = arith.addf %20, %21 : vector<32x128xf32>
    %cst_18 = arith.constant 0.000000e+00 : f32
    %23 = vector.broadcast %cst_18 : f32 to vector<32x128xf32>
    %24 = arith.maximumf %22, %23 : vector<32x128xf32>
    %c1_i32 = arith.constant 1 : i32
    %25 = arith.muli %arg0, %c1_i32 : i32
    %26 = arith.addi %25, %arg1 : i32
    %c32_i32 = arith.constant 32 : i32
    %27 = arith.muli %26, %c32_i32 : i32
    %28 = tpu.iota {dimensions = array<i32: 0>} : vector<32x1xi32>
    %29 = vector.broadcast %27 : i32 to vector<32x1xi32>
    %30 = arith.addi %29, %28 : vector<32x1xi32>
    %c8_i32 = arith.constant 8 : i32
    %31 = vector.broadcast %c8_i32 : i32 to vector<32x1xi32>
    %32 = arith.cmpi slt, %30, %31 : vector<32x1xi32>
    %cst_19 = arith.constant 0.000000e+00 : f32
    %33 = vector.shape_cast %32 : vector<32x1xi1> to vector<32x1xi1>
    %34 = vector.broadcast %33 : vector<32x1xi1> to vector<32x128xi1>
    %35 = vector.broadcast %cst_19 : f32 to vector<32x128xf32>
    %36 = arith.select %34, %24, %35 : vector<32x128xi1>, vector<32x128xf32>
    %c0_20 = arith.constant 0 : index
    %c0_21 = arith.constant 0 : index
    %37 = vector.load %arg12[%c0_20, %c0_21] : memref<1x128xf32, #tpu.memory_space<vmem>>, vector<1x128xf32>
    %cst_22 = arith.constant dense<0.000000e+00> : vector<128xf32>
    %38 = vector.multi_reduction <add>, %36, %cst_22 [0] : vector<32x128xf32> to vector<128xf32>
    %39 = vector.shape_cast %38 : vector<128xf32> to vector<1x128xf32>
    %40 = arith.addf %37, %39 : vector<1x128xf32>
    %c0_23 = arith.constant 0 : index
    %c0_24 = arith.constant 0 : index
    %41 = vector.load %arg12[%c0_23, %c0_24] : memref<1x128xf32, #tpu.memory_space<vmem>>, vector<1x128xf32>
    tpu.vector_store %arg12[%c0_23, %c0_24], %40 {strides = array<i32>} : memref<1x128xf32, #tpu.memory_space<vmem>>, vector<1x128xf32>,
    %c0_i32_25 = arith.constant 0 : i32
    %42 = arith.cmpi eq, %arg1, %c0_i32_25 : i32
    %43 = arith.extui %42 : i1 to i32
    %c0_i32_26 = arith.constant 0 : i32
    %44 = arith.cmpi ne, %43, %c0_i32_26 : i32
    scf.if %44 {
      %c0_27 = arith.constant 0 : index
      %c0_28 = arith.constant 0 : index
      %45 = vector.load %arg12[%c0_27, %c0_28] : memref<1x128xf32, #tpu.memory_space<vmem>>, vector<1x128xf32>
      %cst_29 = arith.constant 1.250000e-01 : f32
      %46 = vector.broadcast %cst_29 : f32 to vector<1x128xf32>
      %47 = arith.mulf %45, %46 : vector<1x128xf32>
      %c0_30 = arith.constant 0 : index
      %c0_31 = arith.constant 0 : index
      %48 = vector.load %arg9[%c0_30, %c0_31] : memref<128x128xf32, #tpu.memory_space<vmem>>, vector<128x128xf32>
      %cst_32 = arith.constant dense<0.000000e+00> : vector<1x128xf32>
      %49 = tpu.matmul %47, %48, %cst_32 {dimension_numbers = #tpu.dot_dimension_numbers<[1], [0], [0], [1], [0, 0, 1, 1], [], []>} : vector<1x128xf32>, vector<128x128xf32>, vector<1x128xf32> -> vector<1x128xf32>
      %c0_33 = arith.constant 0 : index
      %c0_34 = arith.constant 0 : index
      %50 = vector.load %arg10[%c0_33, %c0_34] : memref<1x128xf32, #tpu.memory_space<vmem>>, vector<1x128xf32>
      %cst_35 = arith.constant 1.000000e+00 : f32
      %51 = vector.broadcast %cst_35 : f32 to vector<1x128xf32>
      %52 = arith.mulf %50, %51 : vector<1x128xf32>
      %53 = arith.addf %49, %52 : vector<1x128xf32>
      %54 = vector.shape_cast %53 : vector<1x128xf32> to vector<1x128xf32>
      %55 = vector.broadcast %54 : vector<1x128xf32> to vector<8x128xf32>
      %c0_36 = arith.constant 0 : index
      %c0_37 = arith.constant 0 : index
      %56 = vector.load %arg11[%c0_36, %c0_37] : memref<8x128xf32, #tpu.memory_space<vmem>>, vector<8x128xf32>
      tpu.vector_store %arg11[%c0_36, %c0_37], %55 {strides = array<i32>} : memref<8x128xf32, #tpu.memory_space<vmem>>, vector<8x128xf32>,
    } else {
    }
    return
  }
  func.func @transform_0(%arg0: i32, %arg1: i32) -> (i32, i32) {
    %c1_i32 = arith.constant 1 : i32
    %0 = arith.muli %arg0, %c1_i32 : i32
    %1 = arith.addi %0, %arg1 : i32
    %c0_i32 = arith.constant 0 : i32
    %c0_i32_0 = arith.constant 0 : i32
    return %1, %c0_i32 : i32, i32
  }
  func.func @transform_1(%arg0: i32, %arg1: i32) -> (i32, i32) {
    %c0_i32 = arith.constant 0 : i32
    %c0_i32_0 = arith.constant 0 : i32
    %c0_i32_1 = arith.constant 0 : i32
    return %c0_i32, %c0_i32_0 : i32, i32
  }
  func.func @transform_2(%arg0: i32, %arg1: i32) -> (i32, i32) {
    %c0_i32 = arith.constant 0 : i32
    %c0_i32_0 = arith.constant 0 : i32
    %c0_i32_1 = arith.constant 0 : i32
    return %c0_i32, %c0_i32_0 : i32, i32
  }
  func.func @transform_3(%arg0: i32, %arg1: i32) -> (i32, i32) {
    %c0_i32 = arith.constant 0 : i32
    %c0_i32_0 = arith.constant 0 : i32
    %c0_i32_1 = arith.constant 0 : i32
    return %c0_i32, %c0_i32_0 : i32, i32
  }
  func.func @transform_4(%arg0: i32, %arg1: i32) -> (i32, i32) {
    %c0_i32 = arith.constant 0 : i32
    %c0_i32_0 = arith.constant 0 : i32
    %c0_i32_1 = arith.constant 0 : i32
    return %c0_i32, %c0_i32_0 : i32, i32
  }
  func.func @transform_5(%arg0: i32, %arg1: i32) -> (i32, i32) {
    %c0_i32 = arith.constant 0 : i32
    %c0_i32_0 = arith.constant 0 : i32
    %c0_i32_1 = arith.constant 0 : i32
    return %c0_i32, %c0_i32_0 : i32, i32
  }
  func.func @transform_6(%arg0: i32, %arg1: i32) -> (i32, i32) {
    %c0_i32 = arith.constant 0 : i32
    %c0_i32_0 = arith.constant 0 : i32
    %c0_i32_1 = arith.constant 0 : i32
    return %c0_i32, %c0_i32_0 : i32, i32
  }
  func.func @transform_7(%arg0: i32, %arg1: i32) -> (i32, i32) {
    %c0_i32 = arith.constant 0 : i32
    %c0_i32_0 = arith.constant 0 : i32
    %c0_i32_1 = arith.constant 0 : i32
    return %c0_i32, %c0_i32_0 : i32, i32
  }
  func.func @transform_8(%arg0: i32, %arg1: i32) -> (i32, i32) {
    %c0_i32 = arith.constant 0 : i32
    %c0_i32_0 = arith.constant 0 : i32
    %c0_i32_1 = arith.constant 0 : i32
    return %c0_i32, %c0_i32_0 : i32, i32
  }
  func.func @transform_9(%arg0: i32, %arg1: i32) -> (i32, i32) {
    %c0_i32 = arith.constant 0 : i32
    %c0_i32_0 = arith.constant 0 : i32
    return %arg0, %c0_i32 : i32, i32
  }
}

</mosaic_0001>

<bundles_post_ra>
// kernel: neg.1
= control target key start
LH: loop header
LB: loop body
LE: loop exit
PB: predicated region body
PF: predicated region fallthrough
CT: control target
= control target key end

     0   :  { %s24_s0 = inlined_call_operand.vmem [shape: f32[32,8], index: 0, kind: input, shape index: {}]   ;;  %s25_s1 = inlined_call_operand.vmem [shape: f32[32,8], index: 1, kind: output, shape index: {}]  }
   0x1   :  { %v2_v0 = vld [vmem:[%s24_s0] sm:$0xff] }
   0x2   :  { %v5_v1 = vxor.u32 2147483648, %v2_v0 }
   0x4   :  { %7 = vst [vmem:[%s25_s1] sm:$0xff] %v5_v1 }

// kernel: _lambda_.1
= control target key start
LH: loop header
LB: loop body
LE: loop exit
PB: predicated region body
PF: predicated region fallthrough
CT: control target
= control target key end

     0   :  { %vm72_vm0 = vcmask 130048   ;;  %v738_v47 = vmov 0.0   ;;  %vm739_vm1 = vmmov 0   ;;  %s989_s1 = inlined_call_operand.vmem [shape: f32[16,128], index: 1, kind: input, shape index: {}]   ;;  %s990_s0 = inlined_call_operand.vmem [shape: f32[32,16], index: 0, kind: input, shape index: {}]   ;;  %s991_s3 = inlined_call_operand.vmem [shape: f32[128,128], index: 3, kind: input, shape index: {}]   ;;  %s992_s5 = inlined_call_operand.vmem [shape: f32[128,128], index: 5, kind: input, shape index: {}]   ;;  %s993_s2 = inlined_call_operand.vmem [shape: f32[1,128], index: 2, kind: input, shape index: {}]   ;;  %s994_s4 = inlined_call_operand.vmem [shape: f32[1,128], index: 4, kind: input, shape index: {}]   ;;  %s995_s7 = inlined_call_operand.vmem [shape: f32[128,128], index: 7, kind: input, shape index: {}]   ;;  %s996_s6 = inlined_call_operand.vmem [shape: f32[1,128], index: 6, kind: input, shape index: {}]   ;;  %s997_s8 = inlined_call_operand.vmem [shape: f32[1,128], index: 8, kind: input, shape index: {}]   ;;  %s998_s9 = inlined_call_operand.vmem [shape: f32[8,128], index: 9, kind: output, shape index: {}]  }
   0x1   :  { %v64_v0 = vld [vmem:[%s989_s1 + $0x8] sm:$0xff]  ;;  %v63_v1 = vld [vmem:[%s989_s1] sm:$0xff]  ;;  %v189_v3 = vld [vmem:[%s991_s3 + $0x78] sm:$0xff]  ;;  %58 = vst [vmem:[#allocation2] sm:$0x1] %v738_v47 }
   0x2   :  { %v59_v2 = vld [vmem:[%s990_s0] sm:$0xff]  ;;  %615 = vmatprep.subr.mxu0 %v64_v0  ;;  %v188_v4 = vld [vmem:[%s991_s3 + $0x70] sm:$0xff]  ;;  %v60_v5 = vld [vmem:[%s990_s0 + $0x8] sm:$0xff]  ;;  %625 = vmatprep.subr.mxu1 %v189_v3 }
   0x3   :  { %619 = vmatprep.mubr.msk.f32.mxu0 %vm72_vm0, %v59_v2  ;;  %616 = vmatpush3.msra.mxu0 %v64_v0  ;;  %v187_v6 = vld [vmem:[%s991_s3 + $0x68] sm:$0xff]  ;;  %v186_v7 = vld [vmem:[%s991_s3 + $0x60] sm:$0xff]  ;;  %v185_v8 = vld [vmem:[%s991_s3 + $0x58] sm:$0xff] }
   0x4   :  { %617 = vmatprep.subr.mxu0 %v63_v1  ;;  %626 = vmatpush3.msra.mxu1 %v189_v3  ;;  %v184_v9 = vld [vmem:[%s991_s3 + $0x50] sm:$0xff]  ;;  %v183_v10 = vld [vmem:[%s991_s3 + $0x48] sm:$0xff]  ;;  %v182_v11 = vld [vmem:[%s991_s3 + $0x40] sm:$0xff] }
   0x5   :  { %618 = vmatpush3.msra.mxu0 %v63_v1  ;;  %627 = vmatprep.subr.mxu1 %v188_v4  ;;  %v181_v12 = vld [vmem:[%s991_s3 + $0x38] sm:$0xff]  ;;  %v180_v13 = vld [vmem:[%s991_s3 + $0x30] sm:$0xff]  ;;  %v179_v14 = vld [vmem:[%s991_s3 + $0x28] sm:$0xff] }
   0x6   :  { %620 = vmatmul.mubr.msk.f32.vlgmr.msra.gmra.mxu0 %vm72_vm0, %v60_v5  ;;  %628 = vmatpush3.msra.mxu1 %v188_v4  ;;  %v178_v15 = vld [vmem:[%s991_s3 + $0x20] sm:$0xff]  ;;  %v177_v16 = vld [vmem:[%s991_s3 + $0x18] sm:$0xff]  ;;  %v176_v17 = vld [vmem:[%s991_s3 + $0x10] sm:$0xff] }
   0x7   :  { %629 = vmatprep.subr.mxu1 %v187_v6  ;;  %v175_v18 = vld [vmem:[%s991_s3 + $0x8] sm:$0xff]  ;;  %v174_v19 = vld [vmem:[%s991_s3] sm:$0xff]  ;;  %v61_v20 = vld [vmem:[%s990_s0 + $0x10] sm:$0xff] }
   0x8   :  { %630 = vmatpush3.msra.mxu1 %v187_v6  ;;  %v62_v21 = vld [vmem:[%s990_s0 + $0x18] sm:$0xff]  ;;  %622 = vmatprep.mubr.msk.f32.mxu0 %vm72_vm0, %v61_v20  ;;  %v300_v23 = vld [vmem:[%s992_s5 + $0x70] sm:$0xff]  ;;  %v299_v24 = vld [vmem:[%s992_s5 + $0x68] sm:$0xff] }
   0x9   :  { %631 = vmatprep.subr.mxu1 %v186_v7  ;;  %v301_v22 = vld [vmem:[%s992_s5 + $0x78] sm:$0xff]  ;;  %v298_v25 = vld [vmem:[%s992_s5 + $0x60] sm:$0xff]  ;;  %v296_v27 = vld [vmem:[%s992_s5 + $0x50] sm:$0xff] }
   0xa   :  { %632 = vmatpush3.msra.mxu1 %v186_v7  ;;  %623 = vmatmul.mubr.msk.f32.gmra.mxu0 %vm72_vm0, %v62_v21  ;;  %v297_v26 = vld [vmem:[%s992_s5 + $0x58] sm:$0xff]  ;;  %v295_v28 = vld [vmem:[%s992_s5 + $0x48] sm:$0xff]  ;;  %v294_v29 = vld [vmem:[%s992_s5 + $0x40] sm:$0xff] }
   0xb   :  { %633 = vmatprep.subr.mxu1 %v185_v8  ;;  %663 = vmatprep.subr.mxu0 %v301_v22  ;;  %v293_v30 = vld [vmem:[%s992_s5 + $0x38] sm:$0xff]  ;;  %v292_v31 = vld [vmem:[%s992_s5 + $0x30] sm:$0xff]  ;;  %v291_v32 = vld [vmem:[%s992_s5 + $0x28] sm:$0xff] }
   0xc   :  { %634 = vmatpush3.msra.mxu1 %v185_v8  ;;  %664 = vmatpush3.msra.mxu0 %v301_v22  ;;  %v290_v33 = vld [vmem:[%s992_s5 + $0x20] sm:$0xff]  ;;  %v289_v41 = vld [vmem:[%s992_s5 + $0x18] sm:$0xff]  ;;  %v288_v42 = vld [vmem:[%s992_s5 + $0x10] sm:$0xff] }
   0xd   :  { %635 = vmatprep.subr.mxu1 %v184_v9  ;;  %665 = vmatprep.subr.mxu0 %v300_v23  ;;  %v545_v34 = vld [vmem:[%s993_s2] ss:$0 sm:$0xff]  ;;  %v287_v43 = vld [vmem:[%s992_s5 + $0x8] sm:$0xff]  ;;  %v458_v59 = vld [vmem:[%s995_s7 + $0x78] sm:$0xff] }
   0xe   :  { %636 = vmatpush3.msra.mxu1 %v184_v9  ;;  %666 = vmatpush3.msra.mxu0 %v300_v23  ;;  %v286_v44 = vld [vmem:[%s992_s5] sm:$0xff]  ;;  %v457_v60 = vld [vmem:[%s995_s7 + $0x70] sm:$0xff]  ;;  %v456_v61 = vld [vmem:[%s995_s7 + $0x68] sm:$0xff] }
   0xf   :  { %637 = vmatprep.subr.mxu1 %v183_v10  ;;  %667 = vmatprep.subr.mxu0 %v299_v24  ;;  %v550_v52 = vld [vmem:[%s994_s4] ss:$0 sm:$0xff]  ;;  %v454_v63 = vld [vmem:[%s995_s7 + $0x58] sm:$0xff]  ;;  %v453_v0 = vld [vmem:[%s995_s7 + $0x50] sm:$0xff] }
  0x10   :  { %638 = vmatpush3.msra.mxu1 %v183_v10  ;;  %668 = vmatpush3.msra.mxu0 %v299_v24  ;;  %v455_v62 = vld [vmem:[%s995_s7 + $0x60] sm:$0xff]  ;;  %v452_v1 = vld [vmem:[%s995_s7 + $0x48] sm:$0xff]  ;;  %v450_v3 = vld [vmem:[%s995_s7 + $0x38] sm:$0xff] }
  0x11   :  { %639 = vmatprep.subr.mxu1 %v182_v11  ;;  %669 = vmatprep.subr.mxu0 %v298_v25  ;;  %v451_v2 = vld [vmem:[%s995_s7 + $0x40] sm:$0xff]  ;;  %v449_v4 = vld [vmem:[%s995_s7 + $0x30] sm:$0xff]  ;;  %v448_v6 = vld [vmem:[%s995_s7 + $0x28] sm:$0xff] }
  0x12   :  { %640 = vmatpush3.msra.mxu1 %v182_v11  ;;  %670 = vmatpush3.msra.mxu0 %v298_v25  ;;  %v447_v10 = vld [vmem:[%s995_s7 + $0x20] sm:$0xff]  ;;  %v446_v11 = vld [vmem:[%s995_s7 + $0x18] sm:$0xff] }
  0x13   :  { %641 = vmatprep.subr.mxu1 %v181_v12  ;;  %671 = vmatprep.subr.mxu0 %v297_v26 }
  0x14   :  { %642 = vmatpush3.msra.mxu1 %v181_v12  ;;  %672 = vmatpush3.msra.mxu0 %v297_v26 }
  0x15   :  { %643 = vmatprep.subr.mxu1 %v180_v13  ;;  %673 = vmatprep.subr.mxu0 %v296_v27 }
  0x16   :  { %644 = vmatpush3.msra.mxu1 %v180_v13  ;;  %674 = vmatpush3.msra.mxu0 %v296_v27  ;;  %v426_v27 = vld [vmem:[#allocation2] sm:$0x1] }
  0x17   :  { %645 = vmatprep.subr.mxu1 %v179_v14  ;;  %675 = vmatprep.subr.mxu0 %v295_v28 }
  0x18   :  { %646 = vmatpush3.msra.mxu1 %v179_v14  ;;  %676 = vmatpush3.msra.mxu0 %v295_v28  ;;  %v445_v14 = vld [vmem:[%s995_s7 + $0x10] sm:$0xff] }
  0x19   :  { %647 = vmatprep.subr.mxu1 %v178_v15  ;;  %677 = vmatprep.subr.mxu0 %v294_v29 }
  0x1a   :  { %648 = vmatpush3.msra.mxu1 %v178_v15  ;;  %678 = vmatpush3.msra.mxu0 %v294_v29  ;;  %v444_v15 = vld [vmem:[%s995_s7 + $0x8] sm:$0xff] }
  0x1b   :  { %649 = vmatprep.subr.mxu1 %v177_v16  ;;  %679 = vmatprep.subr.mxu0 %v293_v30 }
  0x1c   :  { %650 = vmatpush3.msra.mxu1 %v177_v16  ;;  %680 = vmatpush3.msra.mxu0 %v293_v30  ;;  %v443_v16 = vld [vmem:[%s995_s7] sm:$0xff] }
  0x1d   :  { %651 = vmatprep.subr.mxu1 %v176_v17  ;;  %681 = vmatprep.subr.mxu0 %v292_v31 }
  0x1e   :  { %652 = vmatpush3.msra.mxu1 %v176_v17  ;;  %682 = vmatpush3.msra.mxu0 %v292_v31 }
  0x1f   :  { %653 = vmatprep.subr.mxu1 %v175_v18  ;;  %683 = vmatprep.subr.mxu0 %v291_v32 }
  0x20   :  { %654 = vmatpush3.msra.mxu1 %v175_v18  ;;  %684 = vmatpush3.msra.mxu0 %v291_v32  ;;  %v551_v18 = vld [vmem:[%s996_s6] ss:$0 sm:$0xff] }
  0x21   :  { %655 = vmatprep.subr.mxu1 %v174_v19  ;;  %685 = vmatprep.subr.mxu0 %v290_v33 }
  0x22   :  { %656 = vmatpush3.msra.mxu1 %v174_v19  ;;  %686 = vmatpush3.msra.mxu0 %v290_v33 }
  0x23   :  { %687 = vmatprep.subr.mxu0 %v289_v41  ;;  %701 = vmatprep.subr.mxu1 %v738_v47 }
  0x24   :  { %688 = vmatpush3.msra.mxu0 %v289_v41 }
  0x25   :  { %689 = vmatprep.subr.mxu0 %v288_v42 }
  0x26   :  { %690 = vmatpush3.msra.mxu0 %v288_v42 }
  0x27   :  { %691 = vmatprep.subr.mxu0 %v287_v43 }
  0x28   :  { %692 = vmatpush3.msra.mxu0 %v287_v43 }
  0x29   :  { %693 = vmatprep.subr.mxu0 %v286_v44 }
  0x2a   :  { %694 = vmatpush3.msra.mxu0 %v286_v44 }
  0xc6   :  { %v621_v35 = vpop.f32.mrf.mxu0 }
  0xc7   :  { %v157_v36 = vadd.f32 %v621_v35, %v545_v34 }
  0xc8   :  { %v151_v37 = vpop.f32.mrf.mxu0 }
  0xc9   :  { %v152_v38 = vadd.f32 %v545_v34, %v151_v37  ;;  %v171_v40 = vmax.f32 %v157_v36, 0.0  ;;  %v459_v36 = vld [vmem:[%s997_s8] sm:$0x1] }
  0xca   :  { %v624_v45 = vpop.f32.mrf.mxu0 }
  0xcb   :  { %v170_v39 = vmax.f32 %v152_v38, 0.0  ;;  %v167_v46 = vadd.f32 %v624_v45, %v545_v34 }
  0xcc   :  { %v161_v48 = vpop.f32.mrf.mxu0 }
  0xcd   :  { %657 = vmatprep.mubr.f32.mxu1 %v170_v39  ;;  %v162_v49 = vadd.f32 %v545_v34, %v161_v48  ;;  %v173_v50 = vmax.f32 %v167_v46, 0.0  ;;  %v530_v34 = vlaneseq }
  0xce   :  { %658 = vmatmul.mubr.f32.vlgmr.msra.gmra.mxu1 %v171_v40 }
  0xcf   :  { %v172_v51 = vmax.f32 %v162_v49, 0.0  ;;  %702 = vmatpush3.msra.mxu1 %v458_v59  ;;  %v531_v35 = vshrl.u32 %v530_v34, 7 }
  0xd0   :  { %703 = vmatprep.subr.mxu1 %v738_v47 }
  0xd1   :  { %660 = vmatprep.mubr.f32.mxu1 %v172_v51  ;;  %704 = vmatpush3.msra.mxu1 %v457_v60  ;;  %v532_v37 = vsub.s32 0, %v531_v35 }
  0xd2   :  { %661 = vmatmul.mubr.f32.gmra.mxu1 %v173_v50  ;;  %705 = vmatprep.subr.mxu1 %v738_v47 }
  0xd3   :  { %706 = vmatpush3.msra.mxu1 %v456_v61  ;;  %733 = vmatprep.mubr.msk.f32.mxu1 %vm739_vm1, %v738_v47 }
  0xd4   :  { %707 = vmatprep.subr.mxu1 %v738_v47 }
  0xd5   :  { %708 = vmatpush3.msra.mxu1 %v455_v62 }
  0xd6   :  { %709 = vmatprep.subr.mxu1 %v738_v47 }
  0xd7   :  { %710 = vmatpush3.msra.mxu1 %v454_v63 }
  0xd8   :  { %711 = vmatprep.subr.mxu1 %v738_v47 }
  0xd9   :  { %712 = vmatpush3.msra.mxu1 %v453_v0 }
  0xda   :  { %713 = vmatprep.subr.mxu1 %v738_v47 }
  0xdb   :  { %714 = vmatpush3.msra.mxu1 %v452_v1 }
  0xdc   :  { %715 = vmatprep.subr.mxu1 %v738_v47 }
  0xdd   :  { %716 = vmatpush3.msra.mxu1 %v451_v2 }
  0xde   :  { %717 = vmatprep.subr.mxu1 %v738_v47 }
  0xdf   :  { %718 = vmatpush3.msra.mxu1 %v450_v3 }
  0xe0   :  { %719 = vmatprep.subr.mxu1 %v738_v47 }
  0xe1   :  { %720 = vmatpush3.msra.mxu1 %v449_v4 }
  0xe2   :  { %721 = vmatprep.subr.mxu1 %v738_v47 }
  0xe3   :  { %722 = vmatpush3.msra.mxu1 %v448_v6 }
  0xe4   :  { %723 = vmatprep.subr.mxu1 %v738_v47 }
  0xe5   :  { %724 = vmatpush3.msra.mxu1 %v447_v10 }
  0xe6   :  { %725 = vmatprep.subr.mxu1 %v738_v47 }
  0xe7   :  { %726 = vmatpush3.msra.mxu1 %v446_v11 }
  0xe8   :  { %727 = vmatprep.subr.mxu1 %v738_v47 }
  0xe9   :  { %728 = vmatpush3.msra.mxu1 %v445_v14 }
  0xea   :  { %729 = vmatprep.subr.mxu1 %v738_v47 }
  0xeb   :  { %730 = vmatpush3.msra.mxu1 %v444_v15 }
  0xec   :  { %731 = vmatprep.subr.mxu1 %v738_v47 }
  0xed   :  { %732 = vmatpush3.msra.mxu1 %v443_v16 }
 0x18e   :  { %v659_v53 = vpop.f32.mrf.mxu1 }
 0x18f   :  { %v269_v54 = vadd.f32 %v659_v53, %v550_v52 }
 0x190   :  { %v263_v55 = vpop.f32.mrf.mxu1 }
 0x191   :  { %v264_v56 = vadd.f32 %v550_v52, %v263_v55  ;;  %v283_v58 = vmax.f32 %v269_v54, 0.0 }
 0x192   :  { %v662_v5 = vpop.f32.mrf.mxu1 }
 0x193   :  { %v282_v57 = vmax.f32 %v264_v56, 0.0  ;;  %v279_v8 = vadd.f32 %v662_v5, %v550_v52 }
 0x194   :  { %v273_v7 = vpop.f32.mrf.mxu1 }
 0x195   :  { %695 = vmatprep.mubr.f32.mxu0 %v282_v57  ;;  %v274_v9 = vadd.f32 %v550_v52, %v273_v7  ;;  %v285_v12 = vmax.f32 %v279_v8, 0.0 }
 0x196   :  { %696 = vmatmul.mubr.f32.vlgmr.msra.gmra.mxu0 %v283_v58 }
 0x197   :  { %v284_v13 = vmax.f32 %v274_v9, 0.0 }
 0x199   :  { %698 = vmatprep.mubr.f32.mxu0 %v284_v13 }
 0x19a   :  { %699 = vmatmul.mubr.f32.gmra.mxu0 %v285_v12 }
 0x256   :  { %v697_v17 = vpop.f32.mrf.mxu0 }
 0x258   :  { %v375_v19 = vpop.f32.mrf.mxu0 }
 0x259   :  { %v376_v20 = vadd.f32 %v551_v18, %v375_v19 }
 0x25a   :  { %v700_v32 = vpop.f32.mrf.mxu0 }
 0x25b   :  { %v394_v21 = vmax.f32 %v376_v20, 0.0 }
 0x25c   :  { %v385_v33 = vpop.f32.mrf.mxu0 }
 0x25d   :  { %v430_v22 = vrot.slane %v394_v21, 4 }
 0x25f   :  { %v431_v23 = vadd.f32 %v430_v22, %v394_v21 }
 0x261   :  { %v432_v24 = vrot.slane %v431_v23, 2 }
 0x263   :  { %v433_v25 = vadd.f32 %v432_v24, %v431_v23 }
 0x265   :  { %v434_v26 = vrot.slane %v433_v25, 1 }
 0x267   :  { %v435_v28 = vadd.f32 %v434_v26, %v433_v25 }
 0x269   :  { %v436_v29 = vadd.f32 %v435_v28, %v426_v27 }
 0x26b   :  { %437 = vst [vmem:[#allocation2] sm:$0x1] %v436_v29 }
 0x272   :  { %v441_v30 = vld [vmem:[#allocation2] sm:$0x1] }
 0x273   :  { %v442_v31 = vmul.f32 0.125, %v441_v30 }
 0x275   :  { %734 = vmatmul.mubr.f32.vlgmr.msra.gmra.mxu1 %v442_v31 }
 0x335   :  { %v526_v38 = vpop.f32.mrf.mxu1 }
 0x336   :  { %v527_v39 = vadd.f32 %v526_v38, %v459_v36 }
 0x337   :  { %v735_v40 = vpop.f32.mrf.mxu1 }
 0x338   :  { %v533_v41 = vrot.slane %v527_v39, %v532_v37 }
 0x33a   :  { %534 = vst [vmem:[%s998_s9] sm:$0xff] %v533_v41 }

</bundles_post_ra>
